<compile_context>
chip_gen: v7x
topology: tpu7x:2x2x1
jax: 0.10.0
libtpu: 0.0.40
codegen_flags: <defaults>
</compile_context>

<pallas_src>
import jax
import jax.numpy as jnp
from jax.experimental import pallas as pl
from jax.experimental.pallas import tpu as pltpu

BN_EPS = 1e-5      # nn.BatchNorm1d default eps
NORM_EPS = 1e-12   # Norm() clamp eps


# ----------------------------- kernel-side helpers -----------------------------
def _l2norm(x):
    # Norm(): x / x.norm(2, dim=1).clamp(min=eps)  ==  x * rsqrt(max(sum(x^2), eps^2))
    ss = jnp.sum(x * x, axis=1, keepdims=True)
    return x * jax.lax.rsqrt(jnp.maximum(ss, NORM_EPS * NORM_EPS))


def _lstm_step(x, w, b_i, b_g, b_o, e):
    # Single time-step LSTM (batch_first, seq_len == 1), h0 = c0 = 0.
    # Forget gate already dropped host-side (f * c0 == 0).  Gate order here: i, g, o.
    gates = jnp.dot(x, w, preferred_element_type=jnp.float32)
    i = jax.nn.sigmoid(gates[:, 0:e] + b_i)
    g = jnp.tanh(gates[:, e:2 * e] + b_g)
    o = jax.nn.sigmoid(gates[:, 2 * e:3 * e] + b_o)
    return o * jnp.tanh(i * g)


# ----------------------------------- kernel ------------------------------------
def mlm_kernel(x_img, x_sum, x_tri, conv_w, w_lstm, w_lin, w_fc1, b_slab, out_ref):
    e = conv_w.shape[1]

    b = b_slab[...]                       # (11, e) bias slab
    conv_b, lin_i_b, lin_s_b, lin_t_b, fc1_b = b[0:1], b[1:2], b[2:3], b[3:4], b[4:5]

    # ---- image branch: Conv1d(k=1) -> Flatten -> ReLU -> (BN folded) -> Linear -> Tanh -> Norm
    h = jnp.dot(x_img[...], conv_w[...], preferred_element_type=jnp.float32) + conv_b
    h = jnp.maximum(h, 0.0)
    h = jnp.dot(h, w_lin[0], preferred_element_type=jnp.float32) + lin_i_b
    img = _l2norm(jnp.tanh(h))

    # ---- summary branch: LSTM -> ReLU -> (BN folded) -> Linear -> Tanh -> Norm
    h = _lstm_step(x_sum[...], w_lstm[0], b[5:6], b[6:7], b[7:8], e)
    h = jnp.maximum(h, 0.0)
    h = jnp.dot(h, w_lin[1], preferred_element_type=jnp.float32) + lin_s_b
    s = _l2norm(jnp.tanh(h))

    # ---- triple branch: LSTM -> ReLU -> (BN folded) -> Dropout(identity) -> Linear -> Norm
    h = _lstm_step(x_tri[...], w_lstm[1], b[8:9], b[9:10], b[10:11], e)
    h = jnp.maximum(h, 0.0)
    h = jnp.dot(h, w_lin[2], preferred_element_type=jnp.float32) + lin_t_b
    t = _l2norm(h)

    # ---- fc1(cat(sum_emb, tri_emb)): one K = 2*emb matmul
    st = jnp.dot(jnp.concatenate([s, t], axis=1), w_fc1[...],
                 preferred_element_type=jnp.float32) + fc1_b

    # lane-packed output: [img | sum | sum_tri]
    out_ref[...] = jnp.concatenate([img, s, st], axis=1)


# ------------------------- host-side parameter packing --------------------------
def prepare_params(p, emb_dim):
    """Fold BN into Linear, drop dead LSTM f-gate, pack into 5 operands."""
    e = emb_dim

    def fold(tag):
        scale = p[f"bn_{tag}_g"][0] * jax.lax.rsqrt(p[f"bn_{tag}_v"][0] + BN_EPS)  # (e,)
        shift = p[f"bn_{tag}_b"][0] - p[f"bn_{tag}_m"][0] * scale                   # (e,)
        w = p[f"lin_{tag}_w"]                                                       # (e, e), used as h @ w
        return scale[:, None] * w, p[f"lin_{tag}_b"][0] + shift @ w

    wi, bi = fold("i")
    ws, bs = fold("s")
    wt, bt = fold("t")

    def drop_f(w4, b4):
        # PyTorch gate order i, f, g, o -> keep i, g, o (f * c0 == 0)
        cols = jnp.concatenate([w4[:, 0:e], w4[:, 2 * e:4 * e]], axis=1)   # (wiki, 3e)
        bias = jnp.concatenate([b4[0, 0:e], b4[0, 2 * e:4 * e]])           # (3e,)
        return cols, bias

    lw_s, lb_s = drop_f(p["lstm_s_w"], p["lstm_s_b"])
    lw_t, lb_t = drop_f(p["lstm_t_w"], p["lstm_t_b"])

    return {
        "conv_w": p["conv_w"],                                             # (img, e)
        "w_lstm": jnp.stack([lw_s, lw_t]),                                 # (2, wiki, 3e)
        "w_lin": jnp.stack([wi, ws, wt]),                                  # (3, e, e)
        "w_fc1": jnp.concatenate([p["fc1_ws"], p["fc1_wt"]], axis=0),      # (2e, e)
        "b_slab": jnp.stack([
            p["conv_b"][0], bi, bs, bt, p["fc1_b"][0],
            lb_s[0:e], lb_s[e:2 * e], lb_s[2 * e:3 * e],
            lb_t[0:e], lb_t[e:2 * e], lb_t[2 * e:3 * e],
        ]),                                                                # (11, e)
    }


def _pick_tb(batch):
    for tb in (256, 128, 64, 32, 16, 8):
        if batch % tb == 0:
            return tb
    return batch   # small / odd batch: one block covering the whole array


# ---------------------------------- wrapper -------------------------------------
def mlm_retrieval_forward(x_img, x_sum, x_tri, packed):
    """Returns [input_emb, sum_emb, sum_tri_t1], each (B, embDim) float32."""
    batch, img_dim = x_img.shape
    wiki_dim = x_sum.shape[1]
    e = packed["conv_w"].shape[1]
    tb = _pick_tb(batch)

    inputs = (x_img, x_sum, x_tri, packed["conv_w"], packed["w_lstm"],
              packed["w_lin"], packed["w_fc1"], packed["b_slab"])

    in_specs = [
        pl.BlockSpec((tb, img_dim), lambda i: (i, 0)),            # streamed per batch tile
        pl.BlockSpec((tb, wiki_dim), lambda i: (i, 0)),
        pl.BlockSpec((tb, wiki_dim), lambda i: (i, 0)),
        pl.BlockSpec((img_dim, e), lambda i: (0, 0)),             # weights: resident
        pl.BlockSpec((2, wiki_dim, 3 * e), lambda i: (0, 0, 0)),
        pl.BlockSpec((3, e, e), lambda i: (0, 0, 0)),
        pl.BlockSpec((2 * e, e), lambda i: (0, 0)),
        pl.BlockSpec((11, e), lambda i: (0, 0)),
    ]
    out_spec = pl.BlockSpec((tb, 3 * e), lambda i: (i, 0))

    flops = int(2 * batch * e * (img_dim + 2 * 3 * wiki_dim + 3 * e + 2 * e))
    bytes_accessed = int(sum(a.size for a in inputs) * 4 + batch * 3 * e * 4)
    transcendentals = int(batch * 10 * e)

    packed_out = pl.pallas_call(
        mlm_kernel,
        out_shape=jax.ShapeDtypeStruct((batch, 3 * e), jnp.float32),
        grid=(pl.cdiv(batch, tb),),
        in_specs=in_specs,
        out_specs=out_spec,
        compiler_params=pltpu.CompilerParams(
            dimension_semantics=("parallel",),     # shard batch tiles across TCs (v7x)
            vmem_limit_bytes=32 * 1024 * 1024,     # explicit; safe on v5e/v6e/v7x
        ),
        cost_estimate=pl.CostEstimate(
            flops=flops, transcendentals=transcendentals, bytes_accessed=bytes_accessed),
    )(*inputs)

    return packed_out[:, 0:e], packed_out[:, e:2 * e], packed_out[:, 2 * e:3 * e]


# ------------------------------- parameter setup --------------------------------
def init_params(key, img_dim, wiki_dim, emb_dim):
    keys = iter(jax.random.split(key, 64))

    def nrm(shape, scale=0.2):
        return (scale * jax.random.normal(next(keys), shape)).astype(jnp.float32)

    p = {}
    # Conv1d(imgDim -> embDim, k=1): weight stored transposed as (imgDim, embDim)
    p["conv_w"] = nrm((img_dim, emb_dim))
    p["conv_b"] = nrm((1, emb_dim))
    for tag in ("i", "s", "t"):
        p[f"bn_{tag}_g"] = (1.0 + nrm((1, emb_dim), 0.1)).astype(jnp.float32)
        p[f"bn_{tag}_b"] = nrm((1, emb_dim), 0.1)
        p[f"bn_{tag}_m"] = nrm((1, emb_dim), 0.1)
        p[f"bn_{tag}_v"] = (1.0 + 0.2 * jnp.abs(jax.random.normal(
            next(keys), (1, emb_dim)))).astype(jnp.float32)
        # Linear(embDim -> embDim): stored transposed as (embDim, embDim)
        p[f"lin_{tag}_w"] = nrm((emb_dim, emb_dim))
        p[f"lin_{tag}_b"] = nrm((1, emb_dim))
    for tag in ("s", "t"):
        # LSTM input weights transposed to (wikiDim, 4*embDim); bias = b_ih + b_hh
        p[f"lstm_{tag}_w"] = nrm((wiki_dim, 4 * emb_dim))
        p[f"lstm_{tag}_b"] = nrm((1, 4 * emb_dim))
    # fc1: Linear(2*embDim -> embDim); weight split into sum-half / triple-half
    p["fc1_ws"] = nrm((emb_dim, emb_dim))
    p["fc1_wt"] = nrm((emb_dim, emb_dim))
    p["fc1_b"] = nrm((1, emb_dim))
    return p


# ------------------------------ pure-JAX reference -------------------------------
def _bn_ref(x, g, b, m, v):
    return (x - m) * (g * jax.lax.rsqrt(v + BN_EPS)) + b


def _l2norm_ref(x):
    n = jnp.sqrt(jnp.sum(x * x, axis=1, keepdims=True))
    return x / jnp.maximum(n, NORM_EPS)


def _lstm_step_ref(x, w_ih, bias, e):
    gates = x @ w_ih + bias            # PyTorch gate order: i, f, g, o; h0 = c0 = 0
    i = jax.nn.sigmoid(gates[:, 0 * e:1 * e])
    g = jnp.tanh(gates[:, 2 * e:3 * e])
    o = jax.nn.sigmoid(gates[:, 3 * e:4 * e])
    return o * jnp.tanh(i * g)


def reference(x_img, x_sum, x_tri, p):
    e = p["lin_i_w"].shape[0]

    h = jnp.maximum(x_img @ p["conv_w"] + p["conv_b"], 0.0)
    h = _bn_ref(h, p["bn_i_g"], p["bn_i_b"], p["bn_i_m"], p["bn_i_v"])
    img = _l2norm_ref(jnp.tanh(h @ p["lin_i_w"] + p["lin_i_b"]))

    h = jnp.maximum(_lstm_step_ref(x_sum, p["lstm_s_w"], p["lstm_s_b"], e), 0.0)
    h = _bn_ref(h, p["bn_s_g"], p["bn_s_b"], p["bn_s_m"], p["bn_s_v"])
    s = _l2norm_ref(jnp.tanh(h @ p["lin_s_w"] + p["lin_s_b"]))

    h = jnp.maximum(_lstm_step_ref(x_tri, p["lstm_t_w"], p["lstm_t_b"], e), 0.0)
    h = _bn_ref(h, p["bn_t_g"], p["bn_t_b"], p["bn_t_m"], p["bn_t_v"])
    t = _l2norm_ref(h @ p["lin_t_w"] + p["lin_t_b"])

    st = s @ p["fc1_ws"] + t @ p["fc1_wt"] + p["fc1_b"]
    return img, s, st


if __name__ == "__main__":
    B, IMG_DIM, WIKI_DIM, EMB_DIM = 8, 32, 24, 32   # args.imgDim / wikiDim / embDim

    key = jax.random.PRNGKey(0)
    k_in, k_p = jax.random.split(key)
    kx, ks, kt = jax.random.split(k_in, 3)
    x_img = jax.random.normal(kx, (B, IMG_DIM), dtype=jnp.float32)   # `input`
    x_sum = jax.random.normal(ks, (B, WIKI_DIM), dtype=jnp.float32)  # `sum`
    x_tri = jax.random.normal(kt, (B, WIKI_DIM), dtype=jnp.float32)  # `triple`
    raw_params = init_params(k_p, IMG_DIM, WIKI_DIM, EMB_DIM)
    packed_params = prepare_params(raw_params, EMB_DIM)

    outs = jax.jit(mlm_retrieval_forward)(x_img, x_sum, x_tri, packed_params)
    outs = jax.block_until_ready(outs)

    refs = reference(x_img, x_sum, x_tri, raw_params)
    for o, r in zip(outs, refs):
        assert o.shape == (B, EMB_DIM) and o.dtype == jnp.float32
        assert jnp.allclose(o, r, atol=2e-3, rtol=2e-3), float(jnp.max(jnp.abs(o - r)))

    print("KERNEL_OK")
</pallas_src>

<mosaic_0001>
module attributes {stable_mosaic.version = 11 : i64} {
  func.func @mlm_kernel(%arg0: i32, %arg1: memref<8x32xf32, #tpu.memory_space<vmem>>, %arg2: memref<8x24xf32, #tpu.memory_space<vmem>>, %arg3: memref<8x24xf32, #tpu.memory_space<vmem>>, %arg4: memref<32x32xf32, #tpu.memory_space<vmem>>, %arg5: memref<2x24x96xf32, #tpu.memory_space<vmem>>, %arg6: memref<3x32x32xf32, #tpu.memory_space<vmem>>, %arg7: memref<64x32xf32, #tpu.memory_space<vmem>>, %arg8: memref<11x32xf32, #tpu.memory_space<vmem>>, %arg9: memref<8x96xf32, #tpu.memory_space<vmem>>) attributes {dimension_semantics = [#tpu.dimension_semantics<parallel>], iteration_bounds = array<i64: 1>, scalar_prefetch = 0 : i64, scratch_operands = 0 : i64, tpu.core_type = #tpu.core_type<tc>, window_params = [{transform_indices = @transform_0, window_bounds = array<i64: 8, 32>}, {transform_indices = @transform_1, window_bounds = array<i64: 8, 24>}, {transform_indices = @transform_2, window_bounds = array<i64: 8, 24>}, {pipeline_mode = #tpu.pipeline_mode<synchronous>, transform_indices = @transform_3, window_bounds = array<i64: 32, 32>}, {pipeline_mode = #tpu.pipeline_mode<synchronous>, transform_indices = @transform_4, window_bounds = array<i64: 2, 24, 96>}, {pipeline_mode = #tpu.pipeline_mode<synchronous>, transform_indices = @transform_5, window_bounds = array<i64: 3, 32, 32>}, {pipeline_mode = #tpu.pipeline_mode<synchronous>, transform_indices = @transform_6, window_bounds = array<i64: 64, 32>}, {pipeline_mode = #tpu.pipeline_mode<synchronous>, transform_indices = @transform_7, window_bounds = array<i64: 11, 32>}, {transform_indices = @transform_8, window_bounds = array<i64: 8, 96>}]} {
    %c0 = arith.constant 0 : index
    %c0_0 = arith.constant 0 : index
    %0 = vector.load %arg8[%c0, %c0_0] : memref<11x32xf32, #tpu.memory_space<vmem>>, vector<11x32xf32>
    %1 = vector.extract_strided_slice %0 {offsets = [0, 0], sizes = [1, 32], strides = [1, 1]} : vector<11x32xf32> to vector<1x32xf32>
    %2 = vector.extract_strided_slice %0 {offsets = [1, 0], sizes = [1, 32], strides = [1, 1]} : vector<11x32xf32> to vector<1x32xf32>
    %3 = vector.extract_strided_slice %0 {offsets = [2, 0], sizes = [1, 32], strides = [1, 1]} : vector<11x32xf32> to vector<1x32xf32>
    %4 = vector.extract_strided_slice %0 {offsets = [3, 0], sizes = [1, 32], strides = [1, 1]} : vector<11x32xf32> to vector<1x32xf32>
    %5 = vector.extract_strided_slice %0 {offsets = [4, 0], sizes = [1, 32], strides = [1, 1]} : vector<11x32xf32> to vector<1x32xf32>
    %c0_1 = arith.constant 0 : index
    %c0_2 = arith.constant 0 : index
    %6 = vector.load %arg1[%c0_1, %c0_2] : memref<8x32xf32, #tpu.memory_space<vmem>>, vector<8x32xf32>
    %c0_3 = arith.constant 0 : index
    %c0_4 = arith.constant 0 : index
    %7 = vector.load %arg4[%c0_3, %c0_4] : memref<32x32xf32, #tpu.memory_space<vmem>>, vector<32x32xf32>
    %cst = arith.constant dense<0.000000e+00> : vector<8x32xf32>
    %8 = tpu.matmul %6, %7, %cst {dimension_numbers = #tpu.dot_dimension_numbers<[1], [0], [0], [1], [0, 0, 1, 1], [], []>} : vector<8x32xf32>, vector<32x32xf32>, vector<8x32xf32> -> vector<8x32xf32>
    %9 = vector.broadcast %1 : vector<1x32xf32> to vector<8x32xf32>
    %10 = arith.addf %8, %9 : vector<8x32xf32>
    %cst_5 = arith.constant 0.000000e+00 : f32
    %11 = vector.broadcast %cst_5 : f32 to vector<8x32xf32>
    %12 = arith.maximumf %10, %11 : vector<8x32xf32>
    %c0_6 = arith.constant 0 : index
    %c0_7 = arith.constant 0 : index
    %c0_8 = arith.constant 0 : index
    %13 = vector.load %arg6[%c0_6, %c0_7, %c0_8] : memref<3x32x32xf32, #tpu.memory_space<vmem>>, vector<1x32x32xf32>
    %14 = vector.shape_cast %13 : vector<1x32x32xf32> to vector<32x32xf32>
    %cst_9 = arith.constant dense<0.000000e+00> : vector<8x32xf32>
    %15 = tpu.matmul %12, %14, %cst_9 {dimension_numbers = #tpu.dot_dimension_numbers<[1], [0], [0], [1], [0, 0, 1, 1], [], []>} : vector<8x32xf32>, vector<32x32xf32>, vector<8x32xf32> -> vector<8x32xf32>
    %16 = vector.broadcast %2 : vector<1x32xf32> to vector<8x32xf32>
    %17 = arith.addf %15, %16 : vector<8x32xf32>
    %18 = math.tanh %17 : vector<8x32xf32>
    %19 = arith.mulf %18, %18 : vector<8x32xf32>
    %cst_10 = arith.constant dense<0.000000e+00> : vector<8xf32>
    %20 = vector.multi_reduction <add>, %19, %cst_10 [1] : vector<8x32xf32> to vector<8xf32>
    %21 = vector.shape_cast %20 : vector<8xf32> to vector<8x1xf32>
    %cst_11 = arith.constant 1.000000e-24 : f32
    %22 = vector.broadcast %cst_11 : f32 to vector<8x1xf32>
    %23 = arith.maximumf %21, %22 : vector<8x1xf32>
    %24 = math.rsqrt %23 : vector<8x1xf32>
    %25 = vector.broadcast %24 : vector<8x1xf32> to vector<8x32xf32>
    %26 = arith.mulf %18, %25 : vector<8x32xf32>
    %c0_12 = arith.constant 0 : index
    %c0_13 = arith.constant 0 : index
    %27 = vector.load %arg2[%c0_12, %c0_13] : memref<8x24xf32, #tpu.memory_space<vmem>>, vector<8x24xf32>
    %c0_14 = arith.constant 0 : index
    %c0_15 = arith.constant 0 : index
    %c0_16 = arith.constant 0 : index
    %28 = vector.load %arg5[%c0_14, %c0_15, %c0_16] : memref<2x24x96xf32, #tpu.memory_space<vmem>>, vector<1x24x96xf32>
    %29 = vector.shape_cast %28 : vector<1x24x96xf32> to vector<24x96xf32>
    %30 = vector.extract_strided_slice %0 {offsets = [5, 0], sizes = [1, 32], strides = [1, 1]} : vector<11x32xf32> to vector<1x32xf32>
    %31 = vector.extract_strided_slice %0 {offsets = [6, 0], sizes = [1, 32], strides = [1, 1]} : vector<11x32xf32> to vector<1x32xf32>
    %32 = vector.extract_strided_slice %0 {offsets = [7, 0], sizes = [1, 32], strides = [1, 1]} : vector<11x32xf32> to vector<1x32xf32>
    %cst_17 = arith.constant dense<0.000000e+00> : vector<8x96xf32>
    %33 = tpu.matmul %27, %29, %cst_17 {dimension_numbers = #tpu.dot_dimension_numbers<[1], [0], [0], [1], [0, 0, 1, 1], [], []>} : vector<8x24xf32>, vector<24x96xf32>, vector<8x96xf32> -> vector<8x96xf32>
    %34 = vector.extract_strided_slice %33 {offsets = [0, 0], sizes = [8, 32], strides = [1, 1]} : vector<8x96xf32> to vector<8x32xf32>
    %35 = vector.broadcast %30 : vector<1x32xf32> to vector<8x32xf32>
    %36 = arith.addf %34, %35 : vector<8x32xf32>
    %37 = arith.negf %36 : vector<8x32xf32>
    %38 = math.exp %37 : vector<8x32xf32>
    %cst_18 = arith.constant 1.000000e+00 : f32
    %39 = vector.broadcast %cst_18 : f32 to vector<8x32xf32>
    %40 = arith.addf %39, %38 : vector<8x32xf32>
    %41 = arith.divf %39, %40 : vector<8x32xf32>
    %42 = vector.extract_strided_slice %33 {offsets = [0, 32], sizes = [8, 32], strides = [1, 1]} : vector<8x96xf32> to vector<8x32xf32>
    %43 = vector.broadcast %31 : vector<1x32xf32> to vector<8x32xf32>
    %44 = arith.addf %42, %43 : vector<8x32xf32>
    %45 = math.tanh %44 : vector<8x32xf32>
    %46 = vector.extract_strided_slice %33 {offsets = [0, 64], sizes = [8, 32], strides = [1, 1]} : vector<8x96xf32> to vector<8x32xf32>
    %47 = vector.broadcast %32 : vector<1x32xf32> to vector<8x32xf32>
    %48 = arith.addf %46, %47 : vector<8x32xf32>
    %49 = arith.negf %48 : vector<8x32xf32>
    %50 = math.exp %49 : vector<8x32xf32>
    %cst_19 = arith.constant 1.000000e+00 : f32
    %51 = vector.broadcast %cst_19 : f32 to vector<8x32xf32>
    %52 = arith.addf %51, %50 : vector<8x32xf32>
    %53 = arith.divf %51, %52 : vector<8x32xf32>
    %54 = arith.mulf %41, %45 : vector<8x32xf32>
    %55 = math.tanh %54 : vector<8x32xf32>
    %56 = arith.mulf %53, %55 : vector<8x32xf32>
    %cst_20 = arith.constant 0.000000e+00 : f32
    %57 = vector.broadcast %cst_20 : f32 to vector<8x32xf32>
    %58 = arith.maximumf %56, %57 : vector<8x32xf32>
    %c1 = arith.constant 1 : index
    %c0_21 = arith.constant 0 : index
    %c0_22 = arith.constant 0 : index
    %59 = vector.load %arg6[%c1, %c0_21, %c0_22] : memref<3x32x32xf32, #tpu.memory_space<vmem>>, vector<1x32x32xf32>
    %60 = vector.shape_cast %59 : vector<1x32x32xf32> to vector<32x32xf32>
    %cst_23 = arith.constant dense<0.000000e+00> : vector<8x32xf32>
    %61 = tpu.matmul %58, %60, %cst_23 {dimension_numbers = #tpu.dot_dimension_numbers<[1], [0], [0], [1], [0, 0, 1, 1], [], []>} : vector<8x32xf32>, vector<32x32xf32>, vector<8x32xf32> -> vector<8x32xf32>
    %62 = vector.broadcast %3 : vector<1x32xf32> to vector<8x32xf32>
    %63 = arith.addf %61, %62 : vector<8x32xf32>
    %64 = math.tanh %63 : vector<8x32xf32>
    %65 = arith.mulf %64, %64 : vector<8x32xf32>
    %cst_24 = arith.constant dense<0.000000e+00> : vector<8xf32>
    %66 = vector.multi_reduction <add>, %65, %cst_24 [1] : vector<8x32xf32> to vector<8xf32>
    %67 = vector.shape_cast %66 : vector<8xf32> to vector<8x1xf32>
    %cst_25 = arith.constant 1.000000e-24 : f32
    %68 = vector.broadcast %cst_25 : f32 to vector<8x1xf32>
    %69 = arith.maximumf %67, %68 : vector<8x1xf32>
    %70 = math.rsqrt %69 : vector<8x1xf32>
    %71 = vector.broadcast %70 : vector<8x1xf32> to vector<8x32xf32>
    %72 = arith.mulf %64, %71 : vector<8x32xf32>
    %c0_26 = arith.constant 0 : index
    %c0_27 = arith.constant 0 : index
    %73 = vector.load %arg3[%c0_26, %c0_27] : memref<8x24xf32, #tpu.memory_space<vmem>>, vector<8x24xf32>
    %c1_28 = arith.constant 1 : index
    %c0_29 = arith.constant 0 : index
    %c0_30 = arith.constant 0 : index
    %74 = vector.load %arg5[%c1_28, %c0_29, %c0_30] : memref<2x24x96xf32, #tpu.memory_space<vmem>>, vector<1x24x96xf32>
    %75 = vector.shape_cast %74 : vector<1x24x96xf32> to vector<24x96xf32>
    %76 = vector.extract_strided_slice %0 {offsets = [8, 0], sizes = [1, 32], strides = [1, 1]} : vector<11x32xf32> to vector<1x32xf32>
    %77 = vector.extract_strided_slice %0 {offsets = [9, 0], sizes = [1, 32], strides = [1, 1]} : vector<11x32xf32> to vector<1x32xf32>
    %78 = vector.extract_strided_slice %0 {offsets = [10, 0], sizes = [1, 32], strides = [1, 1]} : vector<11x32xf32> to vector<1x32xf32>
    %cst_31 = arith.constant dense<0.000000e+00> : vector<8x96xf32>
    %79 = tpu.matmul %73, %75, %cst_31 {dimension_numbers = #tpu.dot_dimension_numbers<[1], [0], [0], [1], [0, 0, 1, 1], [], []>} : vector<8x24xf32>, vector<24x96xf32>, vector<8x96xf32> -> vector<8x96xf32>
    %80 = vector.extract_strided_slice %79 {offsets = [0, 0], sizes = [8, 32], strides = [1, 1]} : vector<8x96xf32> to vector<8x32xf32>
    %81 = vector.broadcast %76 : vector<1x32xf32> to vector<8x32xf32>
    %82 = arith.addf %80, %81 : vector<8x32xf32>
    %83 = arith.negf %82 : vector<8x32xf32>
    %84 = math.exp %83 : vector<8x32xf32>
    %cst_32 = arith.constant 1.000000e+00 : f32
    %85 = vector.broadcast %cst_32 : f32 to vector<8x32xf32>
    %86 = arith.addf %85, %84 : vector<8x32xf32>
    %87 = arith.divf %85, %86 : vector<8x32xf32>
    %88 = vector.extract_strided_slice %79 {offsets = [0, 32], sizes = [8, 32], strides = [1, 1]} : vector<8x96xf32> to vector<8x32xf32>
    %89 = vector.broadcast %77 : vector<1x32xf32> to vector<8x32xf32>
    %90 = arith.addf %88, %89 : vector<8x32xf32>
    %91 = math.tanh %90 : vector<8x32xf32>
    %92 = vector.extract_strided_slice %79 {offsets = [0, 64], sizes = [8, 32], strides = [1, 1]} : vector<8x96xf32> to vector<8x32xf32>
    %93 = vector.broadcast %78 : vector<1x32xf32> to vector<8x32xf32>
    %94 = arith.addf %92, %93 : vector<8x32xf32>
    %95 = arith.negf %94 : vector<8x32xf32>
    %96 = math.exp %95 : vector<8x32xf32>
    %cst_33 = arith.constant 1.000000e+00 : f32
    %97 = vector.broadcast %cst_33 : f32 to vector<8x32xf32>
    %98 = arith.addf %97, %96 : vector<8x32xf32>
    %99 = arith.divf %97, %98 : vector<8x32xf32>
    %100 = arith.mulf %87, %91 : vector<8x32xf32>
    %101 = math.tanh %100 : vector<8x32xf32>
    %102 = arith.mulf %99, %101 : vector<8x32xf32>
    %cst_34 = arith.constant 0.000000e+00 : f32
    %103 = vector.broadcast %cst_34 : f32 to vector<8x32xf32>
    %104 = arith.maximumf %102, %103 : vector<8x32xf32>
    %c2 = arith.constant 2 : index
    %c0_35 = arith.constant 0 : index
    %c0_36 = arith.constant 0 : index
    %105 = vector.load %arg6[%c2, %c0_35, %c0_36] : memref<3x32x32xf32, #tpu.memory_space<vmem>>, vector<1x32x32xf32>
    %106 = vector.shape_cast %105 : vector<1x32x32xf32> to vector<32x32xf32>
    %cst_37 = arith.constant dense<0.000000e+00> : vector<8x32xf32>
    %107 = tpu.matmul %104, %106, %cst_37 {dimension_numbers = #tpu.dot_dimension_numbers<[1], [0], [0], [1], [0, 0, 1, 1], [], []>} : vector<8x32xf32>, vector<32x32xf32>, vector<8x32xf32> -> vector<8x32xf32>
    %108 = vector.broadcast %4 : vector<1x32xf32> to vector<8x32xf32>
    %109 = arith.addf %107, %108 : vector<8x32xf32>
    %110 = arith.mulf %109, %109 : vector<8x32xf32>
    %cst_38 = arith.constant dense<0.000000e+00> : vector<8xf32>
    %111 = vector.multi_reduction <add>, %110, %cst_38 [1] : vector<8x32xf32> to vector<8xf32>
    %112 = vector.shape_cast %111 : vector<8xf32> to vector<8x1xf32>
    %cst_39 = arith.constant 1.000000e-24 : f32
    %113 = vector.broadcast %cst_39 : f32 to vector<8x1xf32>
    %114 = arith.maximumf %112, %113 : vector<8x1xf32>
    %115 = math.rsqrt %114 : vector<8x1xf32>
    %116 = vector.broadcast %115 : vector<8x1xf32> to vector<8x32xf32>
    %117 = arith.mulf %109, %116 : vector<8x32xf32>
    %118 = tpu.concatenate %72, %117 in 1 : vector<8x32xf32>, vector<8x32xf32> -> vector<8x64xf32>
    %c0_40 = arith.constant 0 : index
    %c0_41 = arith.constant 0 : index
    %119 = vector.load %arg7[%c0_40, %c0_41] : memref<64x32xf32, #tpu.memory_space<vmem>>, vector<64x32xf32>
    %cst_42 = arith.constant dense<0.000000e+00> : vector<8x32xf32>
    %120 = tpu.matmul %118, %119, %cst_42 {dimension_numbers = #tpu.dot_dimension_numbers<[1], [0], [0], [1], [0, 0, 1, 1], [], []>} : vector<8x64xf32>, vector<64x32xf32>, vector<8x32xf32> -> vector<8x32xf32>
    %121 = vector.broadcast %5 : vector<1x32xf32> to vector<8x32xf32>
    %122 = arith.addf %120, %121 : vector<8x32xf32>
    %123 = tpu.concatenate %26, %72, %122 in 1 : vector<8x32xf32>, vector<8x32xf32>, vector<8x32xf32> -> vector<8x96xf32>
    %c0_43 = arith.constant 0 : index
    %c0_44 = arith.constant 0 : index
    %124 = vector.load %arg9[%c0_43, %c0_44] : memref<8x96xf32, #tpu.memory_space<vmem>>, vector<8x96xf32>
    tpu.vector_store %arg9[%c0_43, %c0_44], %123 {strides = array<i32>} : memref<8x96xf32, #tpu.memory_space<vmem>>, vector<8x96xf32>,
    return
  }
  func.func @transform_0(%arg0: i32) -> (i32, i32) {
    %c0_i32 = arith.constant 0 : i32
    %c0_i32_0 = arith.constant 0 : i32
    return %arg0, %c0_i32 : i32, i32
  }
  func.func @transform_1(%arg0: i32) -> (i32, i32) {
    %c0_i32 = arith.constant 0 : i32
    %c0_i32_0 = arith.constant 0 : i32
    return %arg0, %c0_i32 : i32, i32
  }
  func.func @transform_2(%arg0: i32) -> (i32, i32) {
    %c0_i32 = arith.constant 0 : i32
    %c0_i32_0 = arith.constant 0 : i32
    return %arg0, %c0_i32 : i32, i32
  }
  func.func @transform_3(%arg0: i32) -> (i32, i32) {
    %c0_i32 = arith.constant 0 : i32
    %c0_i32_0 = arith.constant 0 : i32
    %c0_i32_1 = arith.constant 0 : i32
    return %c0_i32, %c0_i32_0 : i32, i32
  }
  func.func @transform_4(%arg0: i32) -> (i32, i32, i32) {
    %c0_i32 = arith.constant 0 : i32
    %c0_i32_0 = arith.constant 0 : i32
    %c0_i32_1 = arith.constant 0 : i32
    %c0_i32_2 = arith.constant 0 : i32
    return %c0_i32, %c0_i32_0, %c0_i32_1 : i32, i32, i32
  }
  func.func @transform_5(%arg0: i32) -> (i32, i32, i32) {
    %c0_i32 = arith.constant 0 : i32
    %c0_i32_0 = arith.constant 0 : i32
    %c0_i32_1 = arith.constant 0 : i32
    %c0_i32_2 = arith.constant 0 : i32
    return %c0_i32, %c0_i32_0, %c0_i32_1 : i32, i32, i32
  }
  func.func @transform_6(%arg0: i32) -> (i32, i32) {
    %c0_i32 = arith.constant 0 : i32
    %c0_i32_0 = arith.constant 0 : i32
    %c0_i32_1 = arith.constant 0 : i32
    return %c0_i32, %c0_i32_0 : i32, i32
  }
  func.func @transform_7(%arg0: i32) -> (i32, i32) {
    %c0_i32 = arith.constant 0 : i32
    %c0_i32_0 = arith.constant 0 : i32
    %c0_i32_1 = arith.constant 0 : i32
    return %c0_i32, %c0_i32_0 : i32, i32
  }
  func.func @transform_8(%arg0: i32) -> (i32, i32) {
    %c0_i32 = arith.constant 0 : i32
    %c0_i32_0 = arith.constant 0 : i32
    return %arg0, %c0_i32 : i32, i32
  }
}

</mosaic_0001>

<bundles_post_ra>
// kernel: mlm_retrieval_forward.1
= control target key start
LH: loop header
LB: loop body
LE: loop exit
PB: predicated region body
PF: predicated region fallthrough
CT: control target
= control target key end

     0   :  { %13 = vsyncpa [#allocation3], 0  ;;  %s1439_s0 = inlined_call_operand.hbm [shape: f32[8,32], index: 0, kind: input, shape index: {}]   ;;  %s1440_s1 = inlined_call_operand.hbm [shape: f32[8,24], index: 1, kind: input, shape index: {}]   ;;  %s1441_s2 = inlined_call_operand.hbm [shape: f32[8,24], index: 2, kind: input, shape index: {}]   ;;  %s1442_s3 = inlined_call_operand.hbm [shape: f32[32,32], index: 3, kind: input, shape index: {}]   ;;  %s1443_s4 = inlined_call_operand.hbm [shape: f32[2,24,96], index: 4, kind: input, shape index: {}]   ;;  %s1444_s5 = inlined_call_operand.vmem [shape: f32[3,32,32], index: 5, kind: input, shape index: {}]   ;;  %s1445_s6 = inlined_call_operand.vmem [shape: f32[64,32], index: 6, kind: input, shape index: {}]   ;;  %s1446_s7 = inlined_call_operand.vmem [shape: f32[11,32], index: 7, kind: input, shape index: {}]   ;;  %s1447_s8 = inlined_call_operand.vmem [shape: f32[8,96], index: 8, kind: output, shape index: {}]  }
   0x1   :  { %14 = vsyncpa [#allocation5], 0 }
   0x2   :  { %15 = vsyncpa [#allocation8], 0  ;;  %s1153_s27 = smov [#allocation4]   ;;  %s1154_s29 = smov [#allocation7]  }
   0x3   :  { %s32_s28 = sshll.u32 %s1153_s27, 4  ;;  %s51_s30 = sshll.u32 %s1154_s29, 4  ;;  %s33_s28 = int_to_ptr.vmem [resolvable:$true] %s32_s28  ;;  %s1211_s30 = int_to_ptr.vmem [resolvable:$true] %s51_s30 }
   0x4   :  { %s1037_s11 = scalar_lea.hbm %s1440_s1, 128 }
   0x5   :  { %p1038_p0 = scmp.ne.s32.totalorder %s1440_s1, %s1037_s11  ;;  %p1041_p1 = scmp.lt.u32.totalorder %s1037_s11, %s1440_s1 }
   0x7   :  { %p1043_p2 = pnand %p1041_p1, %p1038_p0 }
   0x9   :  { %1046 = shalt.err (!%p1043_p2)
}
   0xa   :  { %s1047_s16 = scalar_lea.vmem %s33_s28, 128  ;;  %p1052_p4 = scmp.lt.s32.totalorder %s33_s28, %s33_s28 }
   0xb   :  { %p1048_p3 = scmp.ne.s32.totalorder %s33_s28, %s1047_s16  ;;  %p1053_p5 = scmp.lt.s32.totalorder %s1047_s16, %s1047_s16 }
   0xd   :  { %p1054_p6 = por %p1053_p5, %p1052_p4 }
   0xf   :  { %p1055_p7 = pnand %p1054_p6, %p1048_p3 }
  0x11   :  { %1058 = shalt.err (!%p1055_p7)
}
  0x12   :  { %35 = dma.hbm_to_vmem [thread:$0]  %s1440_s1, 128, %s33_s28, [#allocation5]  }
  0x13   :  { %s1059_s21 = scalar_lea.hbm %s1442_s3, 512 }
  0x14   :  { %p1060_p8 = scmp.ne.s32.totalorder %s1442_s3, %s1059_s21  ;;  %p1063_p9 = scmp.lt.u32.totalorder %s1059_s21, %s1442_s3 }
  0x16   :  { %p1065_p10 = pnand %p1063_p9, %p1060_p8 }
  0x18   :  { %1068 = shalt.err (!%p1065_p10)
}
  0x19   :  { %s1069_s26 = scalar_lea.vmem %s1211_s30, 512  ;;  %p1074_p12 = scmp.lt.s32.totalorder %s1211_s30, %s1211_s30 }
  0x1a   :  { %p1070_p11 = scmp.ne.s32.totalorder %s1211_s30, %s1069_s26  ;;  %p1075_p13 = scmp.lt.s32.totalorder %s1069_s26, %s1069_s26 }
  0x1c   :  { %p1076_p0 = por %p1075_p13, %p1074_p12 }
  0x1e   :  { %p1077_p1 = pnand %p1076_p0, %p1070_p11 }
  0x20   :  { %1080 = shalt.err (!%p1077_p1)
}
  0x21   :  { %s1155_s1 = smov 128   ;;  %s1156_s27 = smov 8  }
  0x22   :  { %57 = dma.hbm_to_vmem [thread:$0]  %s1442_s3, 512, %s1211_s30, [#allocation8], %s1155_s1, %s1155_s1, %s1156_s27  }
  0x23   :  { %s1157_s9 = smov [#allocation2]   ;;  %s1158_s11 = smov [#allocation6]  }
  0x24   :  { %s22_s10 = sshll.u32 %s1157_s9, 4  ;;  %s42_s12 = sshll.u32 %s1158_s11, 4  ;;  %s23_s10 = int_to_ptr.vmem [resolvable:$true] %s22_s10  ;;  %s43_s12 = int_to_ptr.vmem [resolvable:$true] %s42_s12 }
  0x25   :  { %s1081_s15 = scalar_lea.hbm %s1439_s0, 128 }
  0x26   :  { %p1082_p2 = scmp.ne.s32.totalorder %s1439_s0, %s1081_s15  ;;  %p1085_p3 = scmp.lt.u32.totalorder %s1081_s15, %s1439_s0 }
  0x28   :  { %p1087_p4 = pnand %p1085_p3, %p1082_p2 }
  0x2a   :  { %1090 = shalt.err (!%p1087_p4)
}
  0x2b   :  { %s1091_s3 = scalar_lea.vmem %s23_s10, 128  ;;  %p1096_p6 = scmp.lt.s32.totalorder %s23_s10, %s23_s10 }
  0x2c   :  { %p1092_p5 = scmp.ne.s32.totalorder %s23_s10, %s1091_s3  ;;  %p1097_p7 = scmp.lt.s32.totalorder %s1091_s3, %s1091_s3 }
  0x2e   :  { %p1098_p8 = por %p1097_p7, %p1096_p6 }
  0x30   :  { %p1099_p9 = pnand %p1098_p8, %p1092_p5 }
  0x32   :  { %1102 = shalt.err (!%p1099_p9)
}
  0x33   :  { %25 = dma.hbm_to_vmem [thread:$0]  %s1439_s0, 128, %s23_s10, [#allocation3]  }
  0x34   :  { %s1103_s23 = scalar_lea.hbm %s1441_s2, 128 }
  0x35   :  { %p1104_p10 = scmp.ne.s32.totalorder %s1441_s2, %s1103_s23  ;;  %p1107_p11 = scmp.lt.u32.totalorder %s1103_s23, %s1441_s2 }
  0x37   :  { %p1109_p12 = pnand %p1107_p11, %p1104_p10 }
  0x39   :  { %1112 = shalt.err (!%p1109_p12)
}
  0x3a   :  { %s1113_s29 = scalar_lea.vmem %s43_s12, 128  ;;  %p1118_p0 = scmp.lt.s32.totalorder %s43_s12, %s43_s12 }
  0x3b   :  { %p1114_p13 = scmp.ne.s32.totalorder %s43_s12, %s1113_s29  ;;  %p1119_p1 = scmp.lt.s32.totalorder %s1113_s29, %s1113_s29 }
  0x3d   :  { %p1120_p2 = por %p1119_p1, %p1118_p0 }
  0x3f   :  { %p1121_p3 = pnand %p1120_p2, %p1114_p13 }
  0x41   :  { %1124 = shalt.err (!%p1121_p3)
}
  0x42   :  { %45 = dma.hbm_to_vmem [thread:$0]  %s1441_s2, 128, %s43_s12, [#allocation5]  }
  0x43   :  { %s1159_s10 = smov [#allocation9]   ;;  %s1125_s15 = scalar_lea.hbm %s1443_s4, 768 }
  0x44   :  { %s63_s11 = sshll.u32 %s1159_s10, 4  ;;  %p1126_p4 = scmp.ne.s32.totalorder %s1443_s4, %s1125_s15  ;;  %s64_s11 = int_to_ptr.vmem [resolvable:$true] %s63_s11 }
  0x45   :  { %p1129_p5 = scmp.lt.u32.totalorder %s1125_s15, %s1443_s4 }
  0x47   :  { %p1131_p6 = pnand %p1129_p5, %p1126_p4 }
  0x49   :  { %1134 = shalt.err (!%p1131_p6)
}
  0x4a   :  { %s1135_s3 = scalar_lea.vmem %s64_s11, 768  ;;  %p1140_p8 = scmp.lt.s32.totalorder %s64_s11, %s64_s11 }
  0x4b   :  { %p1136_p7 = scmp.ne.s32.totalorder %s64_s11, %s1135_s3  ;;  %p1141_p9 = scmp.lt.s32.totalorder %s1135_s3, %s1135_s3 }
  0x4d   :  { %p1142_p10 = por %p1141_p9, %p1140_p8 }
  0x4f   :  { %p1143_p11 = pnand %p1142_p10, %p1136_p7 }
  0x51   :  { %1146 = shalt.err (!%p1143_p11)
}
  0x52   :  { %69 = dma.hbm_to_vmem [thread:$0]  %s1443_s4, 768, %s64_s11, [#allocation8], %s1155_s1, %s1155_s1, %s1156_s27  }
  0x53   :  { %1147 = dma.done.wait [#allocation3], 128  }
  0x54   :  { %1148 = vsyncadd [#allocation3], 4294967168 }
  0x55   :  { %1149 = dma.done.wait [#allocation5], 256  }
  0x56   :  { %1150 = vsyncadd [#allocation5], 4294967040 }
  0x57   :  { %1151 = dma.done.wait [#allocation8], 1280  }
  0x58   :  { %1152 = vsyncadd [#allocation8], 4294966016  ;;  %v1160_v0 = vmov 0.0|0.0   ;;  %vm1161_vm0 = vmmov 0   ;;  %v1162_v1 = vmov 0.0   ;;  %v94_v2 = vld [vmem:[#allocation7] sm:$0xff]  ;;  %v98_v15 = vlaneseq }
  0x59   :  { %948 = vmatprep.subr.bf16.mxu0 %v1160_v0  ;;  %875 = vmatprep.mubr.msk.f32.mxu0 %vm1161_vm0, %v1162_v1  ;;  %v95_v3 = vld [vmem:[#allocation7 + $0x8] sm:$0xff]  ;;  %v96_v4 = vld [vmem:[#allocation7 + $0x10] sm:$0xff]  ;;  %v97_v6 = vld [vmem:[#allocation7 + $0x18] sm:$0xff]  ;;  %vm102_vm1 = vcmask 261120   ;;  %vm270_vm2 = vcmask 195584   ;;  %s1163_s29 = smov 32  }
  0x5a   :  { %954 = vmatprep.subr.bf16.mxu1 %v1160_v0  ;;  %886 = vmatprep.mubr.msk.f32.mxu1 %vm1161_vm0, %v1162_v1  ;;  %v949_v5 = vpack.c.bf16 %v95_v3, %v94_v2  ;;  %v177_v7 = vld [vmem:[%s1444_s5] sm:$0xff]  ;;  %v178_v8 = vld [vmem:[%s1444_s5 + $0x8] sm:$0xff]  ;;  %v952_v9 = vpack.c.bf16 %v97_v6, %v96_v4  ;;  %v179_v12 = vld [vmem:[%s1444_s5 + $0x10] sm:$0xff]  ;;  %v1309_v19 = vshrl.u32 %v98_v15, 7  ;;  %s1165_s0 = smov 96   ;;  %vm718_vm3 = vcmask 523264  }
  0x5b   :  { %v955_v10 = vpack.c.bf16 %v178_v8, %v177_v7  ;;  %v93_v11 = vld [vmem:[#allocation2] sm:$0xff]  ;;  %v180_v13 = vld [vmem:[%s1444_s5 + $0x18] sm:$0xff]  ;;  %v486_v16 = vld [vmem:[#allocation9 + $0x18] sm:$0xff]  ;;  %vm802_vm4 = vcmask 785408  }
  0x5c   :  { %950 = vmatpush3.bf16.msra.mxu0 %v949_v5  ;;  %v958_v14 = vpack.c.bf16 %v180_v13, %v179_v12  ;;  %v487_v17 = vld [vmem:[#allocation9 + $0x20] sm:$0xff]  ;;  %v488_v20 = vld [vmem:[#allocation9 + $0x28] sm:$0xff]  ;;  %v357_v21 = vsub.s32 6, %v1309_v19  ;;  %v484_v23 = vld [vmem:[#allocation6] sm:$0xff]  ;;  %v183_v25 = vsub.s32 1, %v1309_v19  ;;  %v367_v28 = vsub.s32 7, %v1309_v19 }
  0x5d   :  { %951 = vmatprep.subr.bf16.mxu0 %v1160_v0  ;;  %956 = vmatpush3.bf16.msra.mxu1 %v955_v10  ;;  %v970_v18 = vpack.c.bf16 %v487_v17, %v486_v16  ;;  %v1316_v22 = vld [vmem:[%s1446_s7] sm:$0xff]  ;;  %v92_v24 = vld [vmem:[%s1446_s7 + $0x8] sm:$0x7]  ;;  %s1164_s7 = smov 64   ;;  %v100_v30 = vsub.s32 0, %v1309_v19  ;;  %v267_v32 = vld [vmem:[#allocation9] sm:$0xff] }
  0x5e   :  { %957 = vmatprep.subr.bf16.mxu1 %v1160_v0  ;;  %v358_v26 = vrot.slane %v1316_v22, %v357_v21  ;;  %v576_v27 = vrot.slane %v92_v24, %v183_v25  ;;  %v368_v29 = vrot.slane %v1316_v22, %v367_v28  ;;  %v268_v33 = vld [vmem:[#allocation9 + $0x8] sm:$0xff]  ;;  %v269_v39 = vld [vmem:[#allocation9 + $0x10] sm:$0xff]  ;;  %v184_v43 = vrot.slane %v1316_v22, %v183_v25  ;;  %v819_v16 = vld [vmem:[%s1444_s5 + $0x38] sm:$0xff] }
  0x5f   :  { %v101_v31 = vrot.slane %v1316_v22, %v100_v30  ;;  %v961_v37 = vpack.c.bf16 %v268_v33, %v267_v32  ;;  %v266_v40 = vld [vmem:[#allocation4] sm:$0xff]  ;;  %v399_v54 = vsub.s32 2, %v1309_v19  ;;  %v346_v57 = vsub.s32 5, %v1309_v19  ;;  %v816_v12 = vld [vmem:[%s1444_s5 + $0x20] sm:$0xff] }
  0x60   :  { %953 = vmatpush3.bf16.msra.mxu0 %v952_v9  ;;  %360 = vrot.lane.b32.xlu0 %v358_v26, %s1163_s29  ;;  %v565_v60 = vrot.slane %v92_v24, %v100_v30  ;;  %v817_v13 = vld [vmem:[%s1444_s5 + $0x28] sm:$0xff] }
  0x61   :  { %969 = vmatprep.subr.bf16.mxu0 %v1160_v0  ;;  %959 = vmatpush3.bf16.msra.mxu1 %v958_v14  ;;  %v586_v56 = vrot.slane %v92_v24, %v399_v54  ;;  %v347_v58 = vrot.slane %v1316_v22, %v346_v57  ;;  %v818_v14 = vld [vmem:[%s1444_s5 + $0x30] sm:$0xff]  ;;  %v964_v15 = vpack.c.bf16 %v817_v13, %v816_v12  ;;  %v713_v12 = vld [vmem:[%s1445_s6 + $0x38] sm:$0xff] }
  0x62   :  { %960 = vmatprep.subr.bf16.mxu1 %v1160_v0  ;;  %v967_v17 = vpack.c.bf16 %v819_v16, %v818_v14 }
  0x63   :  { %876 = vmatmul.mubr.msk.f32.vlgmr.msra.gmra.mrb[0].mxu0 %vm102_vm1, %v93_v11 }
  0x64   :  { %915 = vmatprep.mubr.msk.f32.mxu0 %vm1161_vm0, %v1162_v1  ;;  %971 = vmatpush3.bf16.msra.mxu0 %v970_v18 }
  0x65   :  { %913 = vmatprep.subr.mxu0 %v1162_v1  ;;  %578 = vrot.lane.b32.xlu0 %v576_v27, %s1163_s29 }
  0x68   :  { %914 = vmatpush3.msra.mxu0 %v488_v20 }
  0x69   :  { %916 = vmatmul.mubr.msk.f32.vlgmr.msra.gmra.mrb[2].mxu0 %vm270_vm2, %v484_v23  ;;  %978 = vmatprep.subr.bf16.mxu0 %v1160_v0 }
  0x6a   :  { %945 = vmatprep.mubr.msk.f32.mxu0 %vm1161_vm0, %v1162_v1  ;;  %370 = vrot.lane.b32.xlu0 %v368_v29, %s1164_s7 }
  0xd2   :  { %v361_v44 = vpop.permute.xlu0 %360 }
  0xd7   :  { %v579_v48 = vpop.permute.xlu0 %578 }
  0xdc   :  { %v371_v21 = vpop.permute.xlu0 %370 }
 0x136   :  { %v172_v34 = vpop.f32.mrb[0].mxu0 }
 0x137   :  { %v173_v35 = vadd.f32 %v172_v34, %v101_v31  ;;  %v877_v36 = vpop.f32.mrb[1].mxu0 }
 0x139   :  { %v176_v38 = vmax.f32 %v173_v35, 0.0 }
 0x13b   :  { %887 = vmatmul.mubr.msk.f32.vlgmr.msra.gmra.mrb[0].mxu1 %vm102_vm1, %v176_v38 }
 0x13c   :  { %962 = vmatpush3.bf16.msra.mxu1 %v961_v37  ;;  %895 = vmatprep.mubr.msk.f32.mxu1 %vm1161_vm0, %v1162_v1  ;;  %v1342_v41 = vpop.f32.mrb[2].mxu0 }
 0x13d   :  { %893 = vmatprep.subr.mxu1 %v1162_v1  ;;  %v917_v42 = vpop.f32.mrb[3].mxu0  ;;  %v581_v52 = vadd.f32 %v579_v48, %v1342_v41  ;;  %v566_v62 = vadd.f32 %v565_v60, %v1342_v41 }
 0x13f   :  { %v822_v63 = vmul.f32 -1.442695, %v566_v62 }
 0x140   :  { %894 = vmatpush3.msra.mxu1 %v269_v39 }
 0x141   :  { %896 = vmatmul.mubr.msk.f32.vlgmr.msra.gmra.mrb[2].mxu1 %vm270_vm2, %v266_v40  ;;  %963 = vmatprep.subr.bf16.mxu1 %v1160_v0  ;;  %v824_v40 = vld [vmem:[%s1444_s5 + $0x40] sm:$0xff] }
 0x142   :  { %906 = vmatprep.mubr.msk.f32.mxu1 %vm1161_vm0, %v1162_v1  ;;  %965 = vmatpush3.bf16.msra.mxu1 %v964_v15 }
 0x143   :  { %966 = vmatprep.subr.bf16.mxu1 %v1160_v0 }
 0x146   :  { %968 = vmatpush3.bf16.msra.mxu1 %v967_v17 }
 0x147   :  { %972 = vmatprep.subr.bf16.mxu1 %v1160_v0 }
 0x20e   :  { %v254_v45 = vpop.f32.mrb[0].mxu1 }
 0x20f   :  { %v1345_v46 = vadd.f32 %v254_v45, %v184_v43  ;;  %v888_v47 = vpop.f32.mrb[1].mxu1  ;;  %v826_v43 = vld [vmem:[%s1444_s5 + $0x50] sm:$0xff] }
 0x214   :  { %v340_v49 = vpop.f32.mrb[2].mxu1 }
 0x215   :  { %v363_v50 = vadd.f32 %v361_v44, %v340_v49  ;;  %v897_v51 = vpop.f32.mrb[3].mxu1  ;;  %v348_v59 = vadd.f32 %v347_v58, %v340_v49  ;;  %v373_v23 = vadd.f32 %v371_v21, %v340_v49  ;;  %v827_v44 = vld [vmem:[%s1444_s5 + $0x58] sm:$0xff]  ;;  %v400_v49 = vrot.slane %v1316_v22, %v399_v54 }
 0x216   :  { %v976_v47 = vpack.c.bf16 %v827_v44, %v826_v43 }
 0x217   :  { %1003 = vtanh.f32 %v363_v50  ;;  %v814_v61 = vmul.f32 -1.442695, %v348_v59  ;;  %v815_v25 = vmul.f32 -1.442695, %v373_v23 }
 0x218   :  { %1005 = vtanh.f32 %v581_v52 }
 0x219   :  { %1007 = vpow2.f32 %v814_v61 }
 0x21a   :  { %1009 = vpow2.f32 %v822_v63 }
 0x221   :  { %v1004_v53 = vpop.eup %1003 }
 0x222   :  { %381 = vrot.lane.b32.xlu1 %v1004_v53, %s1165_s0  ;;  %v1006_v55 = vpop.eup %1005  ;;  %v617_v53 = vsub.s32 3, %v1309_v19 }
 0x223   :  { %v1008_v2 = vpop.eup %1007 }
 0x224   :  { %v352_v3 = vadd.f32 1.0, %v1008_v2  ;;  %v1010_v4 = vpop.eup %1009 }
 0x225   :  { %v570_v5 = vadd.f32 1.0, %v1010_v4  ;;  %v708_v4 = vld [vmem:[%s1445_s6 + $0x10] sm:$0xff] }
 0x226   :  { %599 = vrot.lane.b32.xlu1 %v1006_v55, %s1165_s0  ;;  %1011 = vrcp.f32 %v352_v3  ;;  %v707_v3 = vld [vmem:[%s1445_s6 + $0x8] sm:$0xff] }
 0x227   :  { %1013 = vrcp.f32 %v570_v5 }
 0x22a   :  { %588 = vrot.lane.b32.xlu1 %v586_v56, %s1164_s7 }
 0x230   :  { %v1012_v6 = vpop.eup %1011 }
 0x231   :  { %v1014_v9 = vpop.eup %1013 }
 0x294   :  { %v382_v7 = vpop.permute.xlu1 %381 }
 0x295   :  { %v384_v8 = vmul.f32 %v1012_v6, %v382_v7  ;;  %v709_v6 = vld [vmem:[%s1445_s6 + $0x18] sm:$0xff] }
 0x296   :  { %v982_v7 = vpack.c.bf16 %v709_v6, %v708_v4 }
 0x297   :  { %1015 = vtanh.f32 %v384_v8  ;;  %v710_v8 = vld [vmem:[%s1445_s6 + $0x20] sm:$0xff] }
 0x298   :  { %v600_v10 = vpop.permute.xlu1 %599 }
 0x299   :  { %v602_v11 = vmul.f32 %v1014_v9, %v600_v10  ;;  %v711_v9 = vld [vmem:[%s1445_s6 + $0x28] sm:$0xff] }
 0x29a   :  { %v985_v10 = vpack.c.bf16 %v711_v9, %v710_v8 }
 0x29b   :  { %1017 = vtanh.f32 %v602_v11  ;;  %v712_v11 = vld [vmem:[%s1445_s6 + $0x30] sm:$0xff] }
 0x29c   :  { %v589_v24 = vpop.permute.xlu1 %588  ;;  %1019 = vpow2.f32 %v815_v25  ;;  %v988_v13 = vpack.c.bf16 %v713_v12, %v712_v11 }
 0x29d   :  { %v591_v26 = vadd.f32 %v589_v24, %v1342_v41  ;;  %v825_v41 = vld [vmem:[%s1444_s5 + $0x48] sm:$0xff] }
 0x29e   :  { %v973_v42 = vpack.c.bf16 %v825_v41, %v824_v40 }
 0x29f   :  { %v823_v27 = vmul.f32 -1.442695, %v591_v26 }
 0x2a1   :  { %v1016_v18 = vpop.eup %1015  ;;  %1021 = vpow2.f32 %v823_v27 }
 0x2a2   :  { %387 = vrot.lane.b32.xlu0 %v1016_v18, %s1164_s7 }
 0x2a5   :  { %v1018_v20 = vpop.eup %1017 }
 0x2a6   :  { %605 = vrot.lane.b32.xlu1 %v1018_v20, %s1164_s7  ;;  %v1020_v28 = vpop.eup %1019 }
 0x2a7   :  { %v377_v29 = vadd.f32 1.0, %v1020_v28 }
 0x2a9   :  { %1023 = vrcp.f32 %v377_v29 }
 0x2ab   :  { %v1022_v30 = vpop.eup %1021 }
 0x2ac   :  { %v595_v31 = vadd.f32 1.0, %v1022_v30 }
 0x2ae   :  { %1025 = vrcp.f32 %v595_v31 }
 0x2af   :  { %1027 = vtanh.f32 %v1345_v46  ;;  %v706_v46 = vld [vmem:[%s1445_s6] sm:$0xff] }
 0x2b0   :  { %v979_v5 = vpack.c.bf16 %v707_v3, %v706_v46 }
 0x2b2   :  { %980 = vmatpush3.bf16.msra.mxu0 %v979_v5 }
 0x2b3   :  { %v1024_v32 = vpop.eup %1023  ;;  %981 = vmatprep.subr.bf16.mxu0 %v1160_v0 }
 0x2b6   :  { %983 = vmatpush3.bf16.msra.mxu0 %v982_v7 }
 0x2b7   :  { %984 = vmatprep.subr.bf16.mxu0 %v1160_v0 }
 0x2b8   :  { %v1026_v36 = vpop.eup %1025 }
 0x2b9   :  { %v1028_v59 = vpop.eup %1027 }
 0x2ba   :  { %v259_v63 = vmul.f32 %v1028_v59, %v1028_v59  ;;  %986 = vmatpush3.bf16.msra.mxu0 %v985_v10 }
 0x2bb   :  { %987 = vmatprep.subr.bf16.mxu0 %v1160_v0 }
 0x2bc   :  { %v260_v2 = vsel %vm102_vm1, %v259_v63, 0.0 }
 0x2be   :  { %989 = vmatpush3.bf16.msra.mxu0 %v988_v13 }
 0x314   :  { %v388_v33 = vpop.permute.xlu0 %387 }
 0x315   :  { %v390_v34 = vmul.f32 %v1024_v32, %v388_v33 }
 0x317   :  { %v391_v35 = vmax.f32 %v390_v34, 0.0 }
 0x318   :  { %v606_v37 = vpop.permute.xlu1 %605 }
 0x319   :  { %v608_v38 = vmul.f32 %v1026_v36, %v606_v37  ;;  %402 = vrot.lane.b32.xlu0 %v391_v35, %s1164_s7 }
 0x31b   :  { %v609_v39 = vmax.f32 %v608_v38, 0.0 }
 0x31d   :  { %620 = vrot.lane.b32.xlu1 %v609_v39, %s1164_s7 }
 0x38b   :  { %v403_v45 = vpop.permute.xlu0 %402 }
 0x38c   :  { %907 = vmatmul.mubr.msk.f32.vlgmr.msra.gmra.mrb[4].mxu1 %vm102_vm1, %v403_v45 }
 0x38d   :  { %974 = vmatpush3.bf16.msra.mxu1 %v973_v42  ;;  %926 = vmatprep.mubr.msk.f32.mxu1 %vm1161_vm0, %v1162_v1  ;;  %v618_v1 = vrot.slane %v1316_v22, %v617_v53 }
 0x38e   :  { %975 = vmatprep.subr.bf16.mxu1 %v1160_v0  ;;  %v716_v0 = vsub.s32 4, %v1309_v19 }
 0x38f   :  { %v621_v48 = vpop.permute.xlu1 %620 }
 0x390   :  { %v717_v26 = vrot.slane %v1316_v22, %v716_v0 }
 0x391   :  { %977 = vmatpush3.bf16.msra.mxu1 %v976_v47 }
 0x394   :  { %927 = vmatmul.mubr.msk.f32.vlgmr.msra.gmra.mrb[6].mxu1 %vm102_vm1, %v621_v48 }
 0x45f   :  { %v472_v50 = vpop.f32.mrb[4].mxu1 }
 0x460   :  { %v473_v51 = vadd.f32 %v472_v50, %v400_v49  ;;  %v908_v52 = vpop.f32.mrb[5].mxu1 }
 0x462   :  { %1029 = vtanh.f32 %v473_v51 }
 0x467   :  { %v690_v55 = vpop.f32.mrb[6].mxu1 }
 0x468   :  { %v691_v56 = vadd.f32 %v690_v55, %v618_v1  ;;  %v928_v57 = vpop.f32.mrb[7].mxu1 }
 0x46a   :  { %v694_v58 = vmul.f32 %v691_v56, %v691_v56 }
 0x46c   :  { %v1030_v60 = vpop.eup %1029  ;;  %v695_v61 = vsel %vm102_vm1, %v694_v58, 0.0 }
 0x46d   :  { %696 = vadd.xlane.f32.xlu0 %v695_v61  ;;  %v477_v54 = vmul.f32 %v1030_v60, %v1030_v60 }
 0x46f   :  { %v478_v62 = vsel %vm102_vm1, %v477_v54, 0.0 }
 0x470   :  { %479 = vadd.xlane.f32.xlu1 %v478_v62 }
 0x474   :  { %261 = vadd.xlane.f32.xlu1 %v260_v2 }
 0x4fa   :  { %v697_v14 = vpop.xlane.xlu0 %696 }
 0x4fb   :  { %v698_v15 = vmax.f32 %v697_v14, 1e-24 }
 0x4fd   :  { %1031 = vrsqrt.f32 %v698_v15  ;;  %v480_v16 = vpop.xlane.xlu1 %479 }
 0x4fe   :  { %v481_v17 = vmax.f32 %v480_v16, 1e-24 }
 0x500   :  { %1033 = vrsqrt.f32 %v481_v17 }
 0x501   :  { %v262_v30 = vpop.xlane.xlu1 %261 }
 0x502   :  { %v263_v31 = vmax.f32 %v262_v30, 1e-24 }
 0x504   :  { %1035 = vrsqrt.f32 %v263_v31 }
 0x507   :  { %v1032_v18 = vpop.eup %1031 }
 0x508   :  { %v700_v20 = vmul.f32 %v1032_v18, %v691_v56 }
 0x50a   :  { %v1034_v21 = vpop.eup %1033  ;;  %702 = vrot.lane.b32.xlu0 %v700_v20, %s1163_s29 }
 0x50b   :  { %v483_v23 = vmul.f32 %v1034_v21, %v1030_v60 }
 0x50d   :  { %793 = vrot.lane.b32.xlu1 %v483_v23, %s1163_s29 }
 0x50e   :  { %v1036_v32 = vpop.eup %1035 }
 0x50f   :  { %v265_v34 = vmul.f32 %v1036_v32, %v1028_v59 }
 0x57c   :  { %v703_v24 = vpop.permute.xlu0 %702 }
 0x57d   :  { %v705_v25 = vsel %vm102_vm1, %v483_v23, %v703_v24 }
 0x57e   :  { %946 = vmatmul.mubr.msk.f32.vlgmr.msra.gmra.mrb[4].mxu0 %vm718_vm3, %v705_v25 }
 0x57f   :  { %v794_v33 = vpop.permute.xlu1 %793 }
 0x580   :  { %v800_v35 = vsel %vm102_vm1, %v265_v34, %v794_v33 }
 0x651   :  { %v788_v27 = vpop.f32.mrb[4].mxu0 }
 0x652   :  { %v789_v28 = vadd.f32 %v788_v27, %v717_v26  ;;  %v947_v29 = vpop.f32.mrb[5].mxu0 }
 0x654   :  { %797 = vrot.lane.b32.xlu0 %v789_v28, %s1164_s7 }
 0x6c6   :  { %v798_v36 = vpop.permute.xlu0 %797 }
 0x6c7   :  { %v801_v37 = vsel %vm718_vm3, %v800_v35, %v798_v36 }
 0x6c8   :  { %803 = vst.msk [vmem:[%s1447_s8] sm:$0xff] %vm802_vm4, %v801_v37 }
 0x6c9   :  { %808 = vsyncpa [#allocation3], 1 }
 0x6ca   :  { %809 = vsyncpa [#allocation5], 1 }
 0x6cb   :  { %810 = vsyncpa [#allocation8], 1 }

</bundles_post_ra>
